<compile_context>
chip_gen: v5e
topology: v5e:2x2
jax: 0.10.0
libtpu: 0.0.40
codegen_flags: <defaults>
</compile_context>

<pallas_src>
import jax
import jax.numpy as jnp
import numpy as np
from jax.experimental import pallas as pl
from jax.experimental.pallas import tpu as pltpu

SCALE_SPEED = 5.0
_GATHER_WINDOW = 8  # max outstanding row DMAs in the gather path


def _round_up(x, m):
    return ((x + m - 1) // m) * m


def _vmem_capacity_bytes():
    """Physical VMEM per core; conservative 64 MiB fallback (v7x floor)."""
    try:
        info = pltpu.get_tpu_info()
        cap = int(getattr(info, "vmem_capacity_bytes", 0))
        if cap > 0:
            return cap
    except Exception:
        pass
    return 64 * 1024 * 1024


def _vmem_limit_bytes(need, cap):
    """Generation-aware scoped-VMEM limit: headroom over `need`, <= 0.75*cap."""
    limit = max(int(need * 1.5), int(need) + (2 << 20), 16 << 20)
    return int(min(limit, int(0.75 * cap)))


# Does this JAX accept BlockSpec(pipeline_mode=pl.Buffered(1))?  Checked once.
try:
    pl.BlockSpec((8, 128), lambda i: (0, 0), pipeline_mode=pl.Buffered(1))
    _HAS_PIPELINE_MODE = True
except Exception:  # pragma: no cover - older JAX
    _HAS_PIPELINE_MODE = False


# ----------------------------------------------------------------------------
# Path 1: resident table, one-hot MXU gather
# ----------------------------------------------------------------------------
def _onehot_kernel(scale_ref, ids_ref, table_ref, out_ref):
    """One token tile: gather table rows via a one-hot MXU matmul, then scale.

    scale_ref: SMEM (1,)        f32 -- exp(scale_param * scale_speed)
    ids_ref:   VMEM (tt, 1)     i32 -- token ids (pad rows use id 0)
    table_ref: VMEM (v_pad, D)      -- table, vocab zero-padded to 128x
    out_ref:   VMEM (tt, D)
    """
    tt = out_ref.shape[0]
    v_pad = table_ref.shape[0]
    ids = ids_ref[...]                                              # (tt, 1)
    # One-hot values are exactly 0/1 in any float dtype, so build it in the
    # table dtype (bf16 table -> native-rate MXU matmul on v6e/v7x).
    # NOTE: out-of-range / negative ids produce an all-zero row (PyTorch
    # raises); callers must pass valid ids.
    onehot = (jax.lax.broadcasted_iota(jnp.int32, (tt, v_pad), 1) == ids
              ).astype(table_ref.dtype)
    gathered = jnp.dot(onehot, table_ref[...],
                       preferred_element_type=jnp.float32)           # (tt, D)
    out_ref[...] = (gathered * scale_ref[0]).astype(out_ref.dtype)


def _resident_forward(ids2d, table, scale, *, t_pad, tt, v_pad, D, out_dtype,
                      vmem_cap, single_buffer_table):
    itemsize = jnp.dtype(out_dtype).itemsize
    table_bufs = 1 if single_buffer_table else 2
    vmem_need = (table_bufs * v_pad * D * itemsize   # resident table
                 + 2 * tt * 4                        # ids blocks
                 + 2 * tt * D * itemsize             # output blocks
                 + tt * v_pad * 4                    # one-hot temporary
                 + tt * D * 4)                       # f32 matmul result
    if single_buffer_table:
        # Constant index_map -> the table is fetched once per core; a second
        # pipeline buffer would only waste VMEM, so request a single one.
        table_spec = pl.BlockSpec((v_pad, D), lambda i: (0, 0),
                                  pipeline_mode=pl.Buffered(1))
    else:
        table_spec = pl.BlockSpec((v_pad, D), lambda i: (0, 0))
    return pl.pallas_call(
        _onehot_kernel,
        out_shape=jax.ShapeDtypeStruct((t_pad, D), out_dtype),
        grid=(t_pad // tt,),
        in_specs=[
            pl.BlockSpec(memory_space=pltpu.MemorySpace.SMEM),   # scale
            pl.BlockSpec((tt, 1), lambda i: (i, 0)),             # token ids
            table_spec,                                          # table
        ],
        out_specs=pl.BlockSpec((tt, D), lambda i: (i, 0)),
        compiler_params=pltpu.CompilerParams(
            dimension_semantics=("parallel",),
            vmem_limit_bytes=_vmem_limit_bytes(vmem_need, vmem_cap)),
    )(scale, ids2d, table)


# ----------------------------------------------------------------------------
# Path 2: table in HBM, manual-DMA row gather (large vocab)
# ----------------------------------------------------------------------------
def _gather_kernel(ids_ref, scale_ref, table_ref, out_ref, row_buf, sem):
    """One token tile: DMA-gather rows from the HBM table, then scale.

    ids_ref:   SMEM (t_pad,) i32 -- scalar-prefetched flat token ids
    scale_ref: SMEM (1,)     f32 -- exp(scale_param * scale_speed)
    table_ref: ANY  (V, D)       -- embedding table, left in HBM
    out_ref:   VMEM (tt, D)
    row_buf:   VMEM (tt, D)      -- DMA landing buffer
    sem:       DMA semaphore (shared; all row copies have identical size)
    """
    tt = out_ref.shape[0]
    base = pl.program_id(0) * tt
    w = min(_GATHER_WINDOW, tt)

    def _wait_one():
        # Dummy descriptor of the same (1, D) shape: decrements `sem` by one
        # row's worth; all copies are identical-sized so ordering is immaterial.
        pltpu.make_async_copy(table_ref.at[pl.ds(0, 1), :],
                              row_buf.at[pl.ds(0, 1), :], sem).wait()

    def _issue(j, carry):
        @pl.when(j >= w)          # keep at most ~`w` row copies in flight
        def _():
            _wait_one()
        row = ids_ref[base + j]
        pltpu.make_async_copy(table_ref.at[pl.ds(row, 1), :],
                              row_buf.at[pl.ds(j, 1), :], sem).start()
        return carry

    jax.lax.fori_loop(0, tt, _issue, 0)

    def _drain(j, carry):
        _wait_one()
        return carry

    jax.lax.fori_loop(0, w, _drain, 0)

    out_ref[...] = (row_buf[...].astype(jnp.float32) * scale_ref[0]
                    ).astype(out_ref.dtype)


def _gather_forward(flat_ids_padded, table, scale, *, t_pad, tt, D, out_dtype,
                    vmem_cap):
    itemsize = jnp.dtype(out_dtype).itemsize
    t_itemsize = jnp.dtype(table.dtype).itemsize
    vmem_need = (2 * tt * D * itemsize      # output blocks
                 + tt * D * t_itemsize      # row landing buffer
                 + tt * D * 4)              # f32 scale temporary
    grid_spec = pltpu.PrefetchScalarGridSpec(
        num_scalar_prefetch=1,
        grid=(t_pad // tt,),
        in_specs=[
            pl.BlockSpec(memory_space=pltpu.MemorySpace.SMEM),   # scale
            pl.BlockSpec(memory_space=pl.ANY),                   # table in HBM
        ],
        out_specs=pl.BlockSpec((tt, D), lambda i, ids: (i, 0)),
        scratch_shapes=[
            pltpu.VMEM((tt, D), table.dtype),                    # row buffer
            pltpu.SemaphoreType.DMA,                             # shared sem
        ])
    return pl.pallas_call(
        _gather_kernel,
        out_shape=jax.ShapeDtypeStruct((t_pad, D), out_dtype),
        grid_spec=grid_spec,
        compiler_params=pltpu.CompilerParams(
            dimension_semantics=("parallel",),
            vmem_limit_bytes=_vmem_limit_bytes(vmem_need, vmem_cap)),
    )(flat_ids_padded, scale, table)


# ----------------------------------------------------------------------------
# Wrapper / dispatch
# ----------------------------------------------------------------------------
def _token_tile(T, token_tile):
    tt = min(token_tile, _round_up(max(T, 8), 8))
    # v7x has 2 TensorCores per chip; when there is enough work, keep the
    # "parallel" token axis at >= 2 grid steps so both cores get a tile.  On
    # single-TC chips (v5e/v6e) this only trims the tile slightly (still >=256
    # rows), so the per-step overhead stays well amortized.
    if T >= 512:
        tt = min(tt, _round_up(-(-T // 2), 8))
    return tt


def scaled_embedding_forward(ids, weight, scale_param, *,
                             scale_speed=SCALE_SPEED, token_tile=512,
                             method="auto"):
    """Pallas equivalent of ScaledEmbedding.forward.

    ids:         integer array of any shape (*,)
    weight:      (num_embeddings, embedding_dim); padding_idx row already zero
    scale_param: scalar learnable scale parameter
    method:      "auto" | "resident" | "gather"
    returns:     (*, embedding_dim)
    """
    V, D = weight.shape
    out_dtype = weight.dtype
    orig_shape = ids.shape
    flat_ids = ids.reshape(-1).astype(jnp.int32)
    T = int(flat_ids.shape[0])

    itemsize = jnp.dtype(out_dtype).itemsize
    v_pad = _round_up(V, 128)
    vmem_cap = _vmem_capacity_bytes()

    if method == "auto":
        # Keep the resident one-hot path only while one table buffer is a
        # comfortable fraction of VMEM; otherwise gather rows straight from
        # HBM (O(T*D) bytes instead of T*V_pad one-hot work + V*D residency).
        method = ("resident" if v_pad * D * itemsize <= vmem_cap // 4
                  else "gather")

    tt = _token_tile(T, token_tile)
    t_pad = _round_up(T, tt)

    # Both PyTorch branches reduce to "row lookup * exp(scale*scale_speed)";
    # compute the exponentiated scale once, outside the kernel.
    scale = jnp.exp(jnp.asarray(scale_param, jnp.float32) * scale_speed
                    ).reshape(1)

    if method == "resident":
        ids2d = jnp.pad(flat_ids, (0, t_pad - T)).reshape(t_pad, 1)
        table = weight if v_pad == V else jnp.pad(weight,
                                                  ((0, v_pad - V), (0, 0)))
        kwargs = dict(t_pad=t_pad, tt=tt, v_pad=v_pad, D=D,
                      out_dtype=out_dtype, vmem_cap=vmem_cap)
        if _HAS_PIPELINE_MODE:
            try:
                out = _resident_forward(ids2d, table, scale,
                                        single_buffer_table=True, **kwargs)
            except Exception:
                # This JAX/Mosaic build rejected Buffered(1); fall back to the
                # default double-buffered (still correct) table spec.
                out = _resident_forward(ids2d, table, scale,
                                        single_buffer_table=False, **kwargs)
        else:
            out = _resident_forward(ids2d, table, scale,
                                    single_buffer_table=False, **kwargs)
    elif method == "gather":
        ids1d = jnp.pad(flat_ids, (0, t_pad - T))
        out = _gather_forward(ids1d, weight, scale, t_pad=t_pad, tt=tt, D=D,
                              out_dtype=out_dtype, vmem_cap=vmem_cap)
    else:
        raise ValueError(f"unknown method: {method!r}")

    return out[:T].reshape(*orig_shape, D)


def scaled_embedding_ref(ids, weight, scale_param, *, scale_speed=SCALE_SPEED):
    """Pure-JAX reference mirroring the PyTorch forward."""
    scale = jnp.exp(jnp.asarray(scale_param, jnp.float32) * scale_speed)
    return weight[ids.astype(jnp.int32)] * scale


if __name__ == "__main__":
    num_embeddings, embedding_dim, padding_idx = 100, 128, 0
    N, U = 4, 64   # 256 flattened tokens

    key = jax.random.PRNGKey(0)
    k_w, k_ids = jax.random.split(key)

    # ScaledEmbedding init: weight ~ N(0, 0.05^2), padding_idx row zeroed,
    # scale = log(1/0.05) / scale_speed.
    weight = 0.05 * jax.random.normal(
        k_w, (num_embeddings, embedding_dim), jnp.float32)
    weight = weight.at[padding_idx].set(0.0)
    scale_param = jnp.asarray(np.log(1.0 / 0.05) / SCALE_SPEED, jnp.float32)

    ids = jax.random.randint(k_ids, (N, U), 0, num_embeddings, dtype=jnp.int32)
    ref = scaled_embedding_ref(ids, weight, scale_param)

    # Small-vocab resident (one-hot MXU) path -- the auto dispatch for V=100.
    out_resident = scaled_embedding_forward(ids, weight, scale_param,
                                            method="resident")
    jax.block_until_ready(out_resident)
    np.testing.assert_allclose(np.asarray(out_resident), np.asarray(ref),
                               rtol=1e-5, atol=1e-5)
    assert out_resident.shape == (N, U, embedding_dim)

    # Large-vocab manual-DMA row-gather path, forced here on the small table
    # to exercise / validate it.
    out_gather = scaled_embedding_forward(ids, weight, scale_param,
                                          method="gather")
    jax.block_until_ready(out_gather)
    np.testing.assert_allclose(np.asarray(out_gather), np.asarray(ref),
                               rtol=1e-5, atol=1e-5)
    assert out_gather.shape == (N, U, embedding_dim)

    print("KERNEL_OK")
</pallas_src>

<mosaic_0001>
module attributes {stable_mosaic.version = 11 : i64} {
  func.func @_onehot_kernel(%arg0: i32, %arg1: memref<1xf32, #tpu.memory_space<smem>>, %arg2: memref<256x1xi32, #tpu.memory_space<vmem>>, %arg3: memref<128x128xf32, #tpu.memory_space<vmem>>, %arg4: memref<256x128xf32, #tpu.memory_space<vmem>>) attributes {dimension_semantics = [#tpu.dimension_semantics<parallel>], iteration_bounds = array<i64: 1>, scalar_prefetch = 0 : i64, scratch_operands = 0 : i64, tpu.core_type = #tpu.core_type<tc>, window_params = [{transform_indices = @transform_0, window_bounds = array<i64: 1>}, {transform_indices = @transform_1, window_bounds = array<i64: 256, 1>}, {pipeline_mode = #tpu.pipeline_mode<synchronous>, transform_indices = @transform_2, window_bounds = array<i64: 128, 128>}, {transform_indices = @transform_3, window_bounds = array<i64: 256, 128>}]} {
    %c0 = arith.constant 0 : index
    %c0_0 = arith.constant 0 : index
    %0 = vector.load %arg2[%c0, %c0_0] : memref<256x1xi32, #tpu.memory_space<vmem>>, vector<256x1xi32>
    %1 = tpu.iota {dimensions = array<i32: 1>} : vector<256x128xi32>
    %2 = vector.broadcast %0 : vector<256x1xi32> to vector<256x128xi32>
    %3 = arith.cmpi eq, %1, %2 : vector<256x128xi32>
    %4 = arith.extui %3 : vector<256x128xi1> to vector<256x128xi32>
    %5 = arith.sitofp %4 : vector<256x128xi32> to vector<256x128xf32>
    %c0_1 = arith.constant 0 : index
    %c0_2 = arith.constant 0 : index
    %6 = vector.load %arg3[%c0_1, %c0_2] : memref<128x128xf32, #tpu.memory_space<vmem>>, vector<128x128xf32>
    %cst = arith.constant dense<0.000000e+00> : vector<256x128xf32>
    %7 = tpu.matmul %5, %6, %cst {dimension_numbers = #tpu.dot_dimension_numbers<[1], [0], [0], [1], [0, 0, 1, 1], [], []>} : vector<256x128xf32>, vector<128x128xf32>, vector<256x128xf32> -> vector<256x128xf32>
    %c0_3 = arith.constant 0 : index
    %8 = memref.load %arg1[%c0_3] : memref<1xf32, #tpu.memory_space<smem>>
    %9 = vector.broadcast %8 : f32 to vector<256x128xf32>
    %10 = arith.mulf %7, %9 : vector<256x128xf32>
    %c0_4 = arith.constant 0 : index
    %c0_5 = arith.constant 0 : index
    %11 = vector.load %arg4[%c0_4, %c0_5] : memref<256x128xf32, #tpu.memory_space<vmem>>, vector<256x128xf32>
    tpu.vector_store %arg4[%c0_4, %c0_5], %10 {strides = array<i32>} : memref<256x128xf32, #tpu.memory_space<vmem>>, vector<256x128xf32>,
    return
  }
  func.func @transform_0(%arg0: i32) -> i32 {
    %c0_i32 = arith.constant 0 : i32
    %c0_i32_0 = arith.constant 0 : i32
    return %c0_i32 : i32
  }
  func.func @transform_1(%arg0: i32) -> (i32, i32) {
    %c0_i32 = arith.constant 0 : i32
    %c0_i32_0 = arith.constant 0 : i32
    return %arg0, %c0_i32 : i32, i32
  }
  func.func @transform_2(%arg0: i32) -> (i32, i32) {
    %c0_i32 = arith.constant 0 : i32
    %c0_i32_0 = arith.constant 0 : i32
    %c0_i32_1 = arith.constant 0 : i32
    return %c0_i32, %c0_i32_0 : i32, i32
  }
  func.func @transform_3(%arg0: i32) -> (i32, i32) {
    %c0_i32 = arith.constant 0 : i32
    %c0_i32_0 = arith.constant 0 : i32
    return %arg0, %c0_i32 : i32, i32
  }
}

module attributes {stable_mosaic.version = 11 : i64} {
  func.func @_onehot_kernel(%arg0: i32, %arg1: memref<1xf32, #tpu.memory_space<smem>>, %arg2: memref<256x1xi32, #tpu.memory_space<vmem>>, %arg3: memref<128x128xf32, #tpu.memory_space<vmem>>, %arg4: memref<256x128xf32, #tpu.memory_space<vmem>>) attributes {dimension_semantics = [#tpu.dimension_semantics<parallel>], iteration_bounds = array<i64: 1>, scalar_prefetch = 0 : i64, scratch_operands = 0 : i64, tpu.core_type = #tpu.core_type<tc>, window_params = [{transform_indices = @transform_0, window_bounds = array<i64: 1>}, {transform_indices = @transform_1, window_bounds = array<i64: 256, 1>}, {pipeline_mode = #tpu.pipeline_mode<synchronous>, transform_indices = @transform_2, window_bounds = array<i64: 128, 128>}, {transform_indices = @transform_3, window_bounds = array<i64: 256, 128>}]} {
    %c0 = arith.constant 0 : index
    %c0_0 = arith.constant 0 : index
    %0 = vector.load %arg2[%c0, %c0_0] : memref<256x1xi32, #tpu.memory_space<vmem>>, vector<256x1xi32>
    %1 = tpu.iota {dimensions = array<i32: 1>} : vector<256x128xi32>
    %2 = vector.broadcast %0 : vector<256x1xi32> to vector<256x128xi32>
    %3 = arith.cmpi eq, %1, %2 : vector<256x128xi32>
    %4 = arith.extui %3 : vector<256x128xi1> to vector<256x128xi32>
    %5 = arith.sitofp %4 : vector<256x128xi32> to vector<256x128xf32>
    %c0_1 = arith.constant 0 : index
    %c0_2 = arith.constant 0 : index
    %6 = vector.load %arg3[%c0_1, %c0_2] : memref<128x128xf32, #tpu.memory_space<vmem>>, vector<128x128xf32>
    %cst = arith.constant dense<0.000000e+00> : vector<256x128xf32>
    %7 = tpu.matmul %5, %6, %cst {dimension_numbers = #tpu.dot_dimension_numbers<[1], [0], [0], [1], [0, 0, 1, 1], [], []>} : vector<256x128xf32>, vector<128x128xf32>, vector<256x128xf32> -> vector<256x128xf32>
    %c0_3 = arith.constant 0 : index
    %8 = memref.load %arg1[%c0_3] : memref<1xf32, #tpu.memory_space<smem>>
    %9 = vector.broadcast %8 : f32 to vector<256x128xf32>
    %10 = arith.mulf %7, %9 : vector<256x128xf32>
    %c0_4 = arith.constant 0 : index
    %c0_5 = arith.constant 0 : index
    %11 = vector.load %arg4[%c0_4, %c0_5] : memref<256x128xf32, #tpu.memory_space<vmem>>, vector<256x128xf32>
    tpu.vector_store %arg4[%c0_4, %c0_5], %10 {strides = array<i32>} : memref<256x128xf32, #tpu.memory_space<vmem>>, vector<256x128xf32>,
    return
  }
  func.func @transform_0(%arg0: i32) -> i32 {
    %c0_i32 = arith.constant 0 : i32
    %c0_i32_0 = arith.constant 0 : i32
    return %c0_i32 : i32
  }
  func.func @transform_1(%arg0: i32) -> (i32, i32) {
    %c0_i32 = arith.constant 0 : i32
    %c0_i32_0 = arith.constant 0 : i32
    return %arg0, %c0_i32 : i32, i32
  }
  func.func @transform_2(%arg0: i32) -> (i32, i32) {
    %c0_i32 = arith.constant 0 : i32
    %c0_i32_0 = arith.constant 0 : i32
    %c0_i32_1 = arith.constant 0 : i32
    return %c0_i32, %c0_i32_0 : i32, i32
  }
  func.func @transform_3(%arg0: i32) -> (i32, i32) {
    %c0_i32 = arith.constant 0 : i32
    %c0_i32_0 = arith.constant 0 : i32
    return %arg0, %c0_i32 : i32, i32
  }
}

</mosaic_0001>

<bundles_post_ra>
// kernel: tpu_custom_call.1
= control target key start
LH: loop header
LB: loop body
LE: loop exit
PB: predicated region body
PF: predicated region fallthrough
CT: control target
= control target key end

     0   :  { %v601_v3 = vmov 0   ;;  %s876_s0 = inlined_call_operand.<no memory space> [shape: f32[1], index: 0, kind: input, shape index: {}]   ;;  %s877_s1 = inlined_call_operand.vmem [shape: s32[256,1], index: 1, kind: input, shape index: {}]   ;;  %s878_s2 = inlined_call_operand.vmem [shape: f32[128,128], index: 2, kind: input, shape index: {}]   ;;  %s879_s3 = inlined_call_operand.hbm [shape: f32[256,128], index: 3, kind: output, shape index: {}]  }
   0x1   :  { %v33_v0 = vld [vmem:[%s877_s1 + $0x88] sm:$0xff]  ;;  %v32_v1 = vld [vmem:[%s877_s1 + $0x80] sm:$0xff]  ;;  %574 = vset.pattern.permute.xlu2 %v601_v3  ;;  %573 = vset.pattern.permute.xlu1 %v601_v3 }
   0x2   :  { %v16_v2 = vld [vmem:[%s877_s1] sm:$0xff]  ;;  %572 = vset.pattern.permute.xlu0 %v601_v3  ;;  %102 = vperm.xlu2 %574, %v33_v0  }
   0x3   :  { %99 = vperm.xlu0 %572, %v32_v1   ;;  %51 = vperm.xlu1 %573, %v16_v2  }
   0x4   :  { %9 = vsyncpa [#allocation4], 0  ;;  %v41_v4 = vld [vmem:[%s877_s1 + $0xc8] sm:$0xff]  ;;  %v40_v5 = vld [vmem:[%s877_s1 + $0xc0] sm:$0xff]  ;;  %v48_v51 = vlaneseq  ;;  %v602_v56 = vmov 1.0   ;;  %s443_s30 = sshll.u32 %s879_s3, 4  ;;  %s444_s30 = int_to_ptr.hbm [resolvable:$true] %s443_s30 }
   0x5   :  { %v24_v6 = vld [vmem:[%s877_s1 + $0x40] sm:$0xff]  ;;  %v34_v7 = vld [vmem:[%s877_s1 + $0x90] sm:$0xff]  ;;  %v17_v8 = vld [vmem:[%s877_s1 + $0x8] sm:$0xff]  ;;  %s604_s4 = smov 128   ;;  %s605_s5 = smov 8  }
   0x6   :  { %v25_v9 = vld [vmem:[%s877_s1 + $0x48] sm:$0xff]  ;;  %v26_v10 = vld [vmem:[%s877_s1 + $0x50] sm:$0xff]  ;;  %v19_v13 = vld [vmem:[%s877_s1 + $0x18] sm:$0xff]  ;;  %v770_v52 = vand.u32 127, %v48_v51 }
   0x7   :  { %v42_v11 = vld [vmem:[%s877_s1 + $0xd0] sm:$0xff]  ;;  %v35_v14 = vld [vmem:[%s877_s1 + $0x98] sm:$0xff]  ;;  %v44_v16 = vld [vmem:[%s877_s1 + $0xe0] sm:$0xff] }
   0x8   :  { %v18_v12 = vld [vmem:[%s877_s1 + $0x10] sm:$0xff]  ;;  %v43_v15 = vld [vmem:[%s877_s1 + $0xd8] sm:$0xff]  ;;  %v36_v18 = vld [vmem:[%s877_s1 + $0xa0] sm:$0xff] }
   0x9   :  { %v27_v17 = vld [vmem:[%s877_s1 + $0x58] sm:$0xff]  ;;  %v37_v19 = vld [vmem:[%s877_s1 + $0xa8] sm:$0xff]  ;;  %v20_v20 = vld [vmem:[%s877_s1 + $0x20] sm:$0xff] }
   0xa   :  { %126 = vperm.xlu2 %574, %v41_v4   ;;  %v28_v21 = vld [vmem:[%s877_s1 + $0x60] sm:$0xff]  ;;  %v257_v22 = vld [vmem:[%s878_s2 + $0x78] sm:$0xff]  ;;  %v256_v23 = vld [vmem:[%s878_s2 + $0x70] sm:$0xff] }
   0xb   :  { %123 = vperm.xlu0 %572, %v40_v5   ;;  %75 = vperm.xlu1 %573, %v24_v6   ;;  %v255_v24 = vld [vmem:[%s878_s2 + $0x68] sm:$0xff]  ;;  %v254_v28 = vld [vmem:[%s878_s2 + $0x60] sm:$0xff]  ;;  %v253_v29 = vld [vmem:[%s878_s2 + $0x58] sm:$0xff] }
   0xc   :  { %258 = vmatpush.msra.mxu0 %v257_v22  ;;  %520 = vmatpush.msra.mxu2 %v257_v22  ;;  %v29_v25 = vld [vmem:[%s877_s1 + $0x68] sm:$0xff]  ;;  %v22_v30 = vld [vmem:[%s877_s1 + $0x30] sm:$0xff]  ;;  %v250_v35 = vld [vmem:[%s878_s2 + $0x40] sm:$0xff] }
   0xd   :  { %519 = vmatpush.msra.mxu1 %v257_v22  ;;  %521 = vmatpush.msra.mxu3 %v257_v22  ;;  %v45_v26 = vld [vmem:[%s877_s1 + $0xe8] sm:$0xff]  ;;  %v252_v31 = vld [vmem:[%s878_s2 + $0x50] sm:$0xff]  ;;  %v249_v36 = vld [vmem:[%s878_s2 + $0x38] sm:$0xff] }
   0xe   :  { %259 = vmatpush.msra.mxu0 %v256_v23  ;;  %523 = vmatpush.msra.mxu2 %v256_v23  ;;  %v21_v27 = vld [vmem:[%s877_s1 + $0x28] sm:$0xff]  ;;  %v38_v32 = vld [vmem:[%s877_s1 + $0xb0] sm:$0xff]  ;;  %v47_v37 = vld [vmem:[%s877_s1 + $0xf8] sm:$0xff] }
   0xf   :  { %522 = vmatpush.msra.mxu1 %v256_v23  ;;  %524 = vmatpush.msra.mxu3 %v256_v23  ;;  %v46_v33 = vld [vmem:[%s877_s1 + $0xf0] sm:$0xff]  ;;  %v251_v34 = vld [vmem:[%s878_s2 + $0x48] sm:$0xff]  ;;  %v39_v39 = vld [vmem:[%s877_s1 + $0xb8] sm:$0xff] }
  0x10   :  { %260 = vmatpush.msra.mxu0 %v255_v24  ;;  %526 = vmatpush.msra.mxu2 %v255_v24  ;;  %v30_v38 = vld [vmem:[%s877_s1 + $0x70] sm:$0xff]  ;;  %v247_v41 = vld [vmem:[%s878_s2 + $0x28] sm:$0xff]  ;;  %v246_v42 = vld [vmem:[%s878_s2 + $0x20] sm:$0xff] }
  0x11   :  { %525 = vmatpush.msra.mxu1 %v255_v24  ;;  %527 = vmatpush.msra.mxu3 %v255_v24  ;;  %v248_v40 = vld [vmem:[%s878_s2 + $0x30] sm:$0xff]  ;;  %v245_v43 = vld [vmem:[%s878_s2 + $0x18] sm:$0xff]  ;;  %v243_v47 = vld [vmem:[%s878_s2 + $0x8] sm:$0xff] }
  0x12   :  { %105 = vperm.xlu2 %574, %v34_v7   ;;  %261 = vmatpush.msra.mxu0 %v254_v28  ;;  %v23_v44 = vld [vmem:[%s877_s1 + $0x38] sm:$0xff]  ;;  %v244_v46 = vld [vmem:[%s878_s2 + $0x10] sm:$0xff]  ;;  %v242_v48 = vld [vmem:[%s878_s2] sm:$0xff] }
  0x13   :  { %54 = vperm.xlu0 %572, %v17_v8   ;;  %78 = vperm.xlu1 %573, %v25_v9   ;;  %v31_v45 = vld [vmem:[%s877_s1 + $0x78] sm:$0xff] }
  0x14   :  { %529 = vmatpush.msra.mxu2 %v254_v28  ;;  %528 = vmatpush.msra.mxu1 %v254_v28 }
  0x15   :  { %530 = vmatpush.msra.mxu3 %v254_v28  ;;  %262 = vmatpush.msra.mxu0 %v253_v29 }
  0x16   :  { %532 = vmatpush.msra.mxu2 %v253_v29  ;;  %531 = vmatpush.msra.mxu1 %v253_v29 }
  0x17   :  { %533 = vmatpush.msra.mxu3 %v253_v29  ;;  %263 = vmatpush.msra.mxu0 %v252_v31 }
  0x18   :  { %535 = vmatpush.msra.mxu2 %v252_v31  ;;  %534 = vmatpush.msra.mxu1 %v252_v31 }
  0x19   :  { %264 = vmatpush.msra.mxu0 %v251_v34  ;;  %536 = vmatpush.msra.mxu3 %v252_v31 }
  0x1a   :  { %81 = vperm.xlu2 %574, %v26_v10   ;;  %538 = vmatpush.msra.mxu2 %v251_v34 }
  0x1b   :  { %129 = vperm.xlu0 %572, %v42_v11   ;;  %57 = vperm.xlu1 %573, %v18_v12  }
  0x1c   :  { %265 = vmatpush.msra.mxu0 %v250_v35  ;;  %537 = vmatpush.msra.mxu1 %v251_v34 }
  0x1d   :  { %539 = vmatpush.msra.mxu3 %v251_v34  ;;  %541 = vmatpush.msra.mxu2 %v250_v35 }
  0x1e   :  { %266 = vmatpush.msra.mxu0 %v249_v36  ;;  %540 = vmatpush.msra.mxu1 %v250_v35 }
  0x1f   :  { %542 = vmatpush.msra.mxu3 %v250_v35  ;;  %544 = vmatpush.msra.mxu2 %v249_v36 }
  0x20   :  { %267 = vmatpush.msra.mxu0 %v248_v40  ;;  %543 = vmatpush.msra.mxu1 %v249_v36 }
  0x21   :  { %547 = vmatpush.msra.mxu2 %v248_v40  ;;  %545 = vmatpush.msra.mxu3 %v249_v36 }
  0x22   :  { %60 = vperm.xlu2 %574, %v19_v13   ;;  %268 = vmatpush.msra.mxu0 %v247_v41 }
  0x23   :  { %108 = vperm.xlu0 %572, %v35_v14   ;;  %132 = vperm.xlu1 %573, %v43_v15  }
  0x24   :  { %550 = vmatpush.msra.mxu2 %v247_v41  ;;  %546 = vmatpush.msra.mxu1 %v248_v40 }
  0x25   :  { %548 = vmatpush.msra.mxu3 %v248_v40  ;;  %269 = vmatpush.msra.mxu0 %v246_v42 }
  0x26   :  { %553 = vmatpush.msra.mxu2 %v246_v42  ;;  %549 = vmatpush.msra.mxu1 %v247_v41 }
  0x27   :  { %551 = vmatpush.msra.mxu3 %v247_v41  ;;  %270 = vmatpush.msra.mxu0 %v245_v43 }
  0x28   :  { %556 = vmatpush.msra.mxu2 %v245_v43  ;;  %552 = vmatpush.msra.mxu1 %v246_v42 }
  0x29   :  { %271 = vmatpush.msra.mxu0 %v244_v46  ;;  %554 = vmatpush.msra.mxu3 %v246_v42 }
  0x2a   :  { %135 = vperm.xlu2 %574, %v44_v16   ;;  %559 = vmatpush.msra.mxu2 %v244_v46 }
  0x2b   :  { %84 = vperm.xlu0 %572, %v27_v17   ;;  %111 = vperm.xlu1 %573, %v36_v18  }
  0x2c   :  { %272 = vmatpush.msra.mxu0 %v243_v47  ;;  %562 = vmatpush.msra.mxu2 %v243_v47 }
  0x2d   :  { %555 = vmatpush.msra.mxu1 %v245_v43  ;;  %557 = vmatpush.msra.mxu3 %v245_v43 }
  0x2e   :  { %273 = vmatpush.msra.mxu0 %v242_v48  ;;  %565 = vmatpush.msra.mxu2 %v242_v48 }
  0x2f   :  { %558 = vmatpush.msra.mxu1 %v244_v46  ;;  %560 = vmatpush.msra.mxu3 %v244_v46 }
  0x31   :  { %561 = vmatpush.msra.mxu1 %v243_v47  ;;  %563 = vmatpush.msra.mxu3 %v243_v47 }
  0x32   :  { %114 = vperm.xlu2 %574, %v37_v19  }
  0x33   :  { %63 = vperm.xlu0 %572, %v20_v20   ;;  %87 = vperm.xlu1 %573, %v28_v21   ;;  %v839_v20 = vstv %s876_s0  ;;  %s603_s0 = smov [#allocation3]  }
  0x34   :  { %564 = vmatpush.msra.mxu1 %v242_v48  ;;  %566 = vmatpush.msra.mxu3 %v242_v48  ;;  %s441_s27 = sshll.u32 %s603_s0, 4  ;;  %s442_s27 = int_to_ptr.vmem [resolvable:$true] %s441_s27 }
  0x3a   :  { %90 = vperm.xlu2 %574, %v29_v25  }
  0x3b   :  { %138 = vperm.xlu0 %572, %v45_v26   ;;  %66 = vperm.xlu1 %573, %v21_v27  }
  0x42   :  { %69 = vperm.xlu2 %574, %v22_v30  }
  0x43   :  { %117 = vperm.xlu0 %572, %v38_v32   ;;  %141 = vperm.xlu1 %573, %v46_v33  }
  0x4a   :  { %144 = vperm.xlu2 %574, %v47_v37  }
  0x4b   :  { %93 = vperm.xlu0 %572, %v30_v38   ;;  %120 = vperm.xlu1 %573, %v39_v39  }
  0x53   :  { %72 = vperm.xlu0 %572, %v23_v44   ;;  %96 = vperm.xlu1 %573, %v31_v45  }
  0x5c   :  { %v103_v49 = vpop.permute.xlu2 %102 }
  0x5d   :  { %vm163_vm2 = vcmp.eq.s32.totalorder %v770_v52, %v103_v49 }
  0x64   :  { %v127_v50 = vpop.permute.xlu2 %126 }
  0x65   :  { %vm171_vm7 = vcmp.eq.s32.totalorder %v770_v52, %v127_v50 }
  0x6c   :  { %v106_v55 = vpop.permute.xlu2 %105 }
  0x6d   :  { %vm164_vm8 = vcmp.eq.s32.totalorder %v770_v52, %v106_v55 }
  0x74   :  { %v82_v59 = vpop.permute.xlu2 %81 }
  0x75   :  { %v100_v53 = vpop.permute.xlu0 %99  ;;  %v52_v54 = vpop.permute.xlu1 %51  ;;  %vm156_vm9 = vcmp.eq.s32.totalorder %v770_v52, %v82_v59 }
  0x76   :  { %vm162_vm0 = vcmp.eq.s32.totalorder %v770_v52, %v100_v53  ;;  %vm146_vm1 = vcmp.eq.s32.totalorder %v770_v52, %v52_v54 }
  0x77   :  { %487 = vmatmul.msk.f32.vlgmr.msra.gmra.mxu0 %vm146_vm1, %v602_v56  ;;  %503 = vmatmul.msk.f32.vlgmr.msra.gmra.mxu2 %vm162_vm0, %v602_v56 }
  0x7c   :  { %v61_v62 = vpop.permute.xlu2 %60 }
  0x7d   :  { %v124_v57 = vpop.permute.xlu0 %123  ;;  %v76_v58 = vpop.permute.xlu1 %75  ;;  %vm149_vm12 = vcmp.eq.s32.totalorder %v770_v52, %v61_v62 }
  0x7e   :  { %vm170_vm3 = vcmp.eq.s32.totalorder %v770_v52, %v124_v57  ;;  %vm154_vm4 = vcmp.eq.s32.totalorder %v770_v52, %v76_v58 }
  0x7f   :  { %495 = vmatmul.msk.f32.vlgmr.msra.gmra.mxu1 %vm154_vm4, %v602_v56  ;;  %504 = vmatmul.msk.f32.gmra.mxu2 %vm163_vm2, %v602_v56 }
  0x80   :  { %511 = vmatmul.msk.f32.vlgmr.msra.gmra.mxu3 %vm170_vm3, %v602_v56 }
  0x84   :  { %v136_v1 = vpop.permute.xlu2 %135 }
  0x85   :  { %v55_v60 = vpop.permute.xlu0 %54  ;;  %v79_v61 = vpop.permute.xlu1 %78  ;;  %vm174_vm1 = vcmp.eq.s32.totalorder %v770_v52, %v136_v1 }
  0x86   :  { %vm147_vm5 = vcmp.eq.s32.totalorder %v770_v52, %v55_v60  ;;  %vm155_vm6 = vcmp.eq.s32.totalorder %v770_v52, %v79_v61 }
  0x87   :  { %488 = vmatmul.msk.f32.gmra.mxu0 %vm147_vm5, %v602_v56  ;;  %496 = vmatmul.msk.f32.gmra.mxu1 %vm155_vm6, %v602_v56 }
  0x88   :  { %505 = vmatmul.msk.f32.gmra.mxu2 %vm164_vm8, %v602_v56  ;;  %512 = vmatmul.msk.f32.gmra.mxu3 %vm171_vm7, %v602_v56 }
  0x8c   :  { %v115_v6 = vpop.permute.xlu2 %114 }
  0x8d   :  { %v130_v63 = vpop.permute.xlu0 %129  ;;  %v58_v0 = vpop.permute.xlu1 %57  ;;  %vm167_vm4 = vcmp.eq.s32.totalorder %v770_v52, %v115_v6 }
  0x8e   :  { %vm172_vm10 = vcmp.eq.s32.totalorder %v770_v52, %v130_v63  ;;  %vm148_vm11 = vcmp.eq.s32.totalorder %v770_v52, %v58_v0 }
  0x8f   :  { %489 = vmatmul.msk.f32.gmra.mxu0 %vm148_vm11, %v602_v56  ;;  %497 = vmatmul.msk.f32.gmra.mxu1 %vm156_vm9, %v602_v56 }
  0x90   :  { %513 = vmatmul.msk.f32.gmra.mxu3 %vm172_vm10, %v602_v56 }
  0x94   :  { %v91_v9 = vpop.permute.xlu2 %90 }
  0x95   :  { %v109_v2 = vpop.permute.xlu0 %108  ;;  %v133_v3 = vpop.permute.xlu1 %132  ;;  %vm159_vm5 = vcmp.eq.s32.totalorder %v770_v52, %v91_v9 }
  0x96   :  { %vm165_vm13 = vcmp.eq.s32.totalorder %v770_v52, %v109_v2  ;;  %vm173_vm14 = vcmp.eq.s32.totalorder %v770_v52, %v133_v3 }
  0x97   :  { %490 = vmatmul.msk.f32.gmra.mxu0 %vm149_vm12, %v602_v56  ;;  %506 = vmatmul.msk.f32.gmra.mxu2 %vm165_vm13, %v602_v56 }
  0x98   :  { %514 = vmatmul.msk.f32.gmra.mxu3 %vm173_vm14, %v602_v56 }
  0x9c   :  { %v70_v12 = vpop.permute.xlu2 %69 }
  0x9d   :  { %v85_v4 = vpop.permute.xlu0 %84  ;;  %v112_v5 = vpop.permute.xlu1 %111  ;;  %vm152_vm8 = vcmp.eq.s32.totalorder %v770_v52, %v70_v12 }
  0x9e   :  { %vm157_vm15 = vcmp.eq.s32.totalorder %v770_v52, %v85_v4  ;;  %vm166_vm0 = vcmp.eq.s32.totalorder %v770_v52, %v112_v5 }
  0x9f   :  { %498 = vmatmul.msk.f32.gmra.mxu1 %vm157_vm15, %v602_v56  ;;  %507 = vmatmul.msk.f32.gmra.mxu2 %vm166_vm0, %v602_v56 }
  0xa0   :  { %515 = vmatmul.msk.f32.gmra.mxu3 %vm174_vm1, %v602_v56 }
  0xa4   :  { %v145_v15 = vpop.permute.xlu2 %144 }
  0xa5   :  { %v64_v7 = vpop.permute.xlu0 %63  ;;  %v88_v8 = vpop.permute.xlu1 %87  ;;  %vm177_vm13 = vcmp.eq.s32.totalorder %v770_v52, %v145_v15 }
  0xa6   :  { %vm150_vm2 = vcmp.eq.s32.totalorder %v770_v52, %v64_v7  ;;  %vm158_vm3 = vcmp.eq.s32.totalorder %v770_v52, %v88_v8 }
  0xa7   :  { %491 = vmatmul.msk.f32.gmra.mxu0 %vm150_vm2, %v602_v56  ;;  %499 = vmatmul.msk.f32.gmra.mxu1 %vm158_vm3, %v602_v56 }
  0xa8   :  { %508 = vmatmul.msk.f32.gmra.mxu2 %vm167_vm4, %v602_v56 }
  0xad   :  { %v139_v10 = vpop.permute.xlu0 %138  ;;  %v67_v11 = vpop.permute.xlu1 %66 }
  0xae   :  { %vm175_vm6 = vcmp.eq.s32.totalorder %v770_v52, %v139_v10  ;;  %vm151_vm7 = vcmp.eq.s32.totalorder %v770_v52, %v67_v11 }
  0xaf   :  { %492 = vmatmul.msk.f32.gmra.mxu0 %vm151_vm7, %v602_v56  ;;  %500 = vmatmul.msk.f32.gmra.mxu1 %vm159_vm5, %v602_v56 }
  0xb0   :  { %516 = vmatmul.msk.f32.gmra.mxu3 %vm175_vm6, %v602_v56 }
  0xb5   :  { %v118_v13 = vpop.permute.xlu0 %117  ;;  %v142_v14 = vpop.permute.xlu1 %141 }
  0xb6   :  { %vm168_vm9 = vcmp.eq.s32.totalorder %v770_v52, %v118_v13  ;;  %vm176_vm10 = vcmp.eq.s32.totalorder %v770_v52, %v142_v14 }
  0xb7   :  { %493 = vmatmul.msk.f32.gmra.mxu0 %vm152_vm8, %v602_v56  ;;  %509 = vmatmul.msk.f32.gmra.mxu2 %vm168_vm9, %v602_v56 }
  0xb8   :  { %517 = vmatmul.msk.f32.gmra.mxu3 %vm176_vm10, %v602_v56 }
  0xbd   :  { %v94_v16 = vpop.permute.xlu0 %93  ;;  %v121_v17 = vpop.permute.xlu1 %120 }
  0xbe   :  { %vm160_vm11 = vcmp.eq.s32.totalorder %v770_v52, %v94_v16  ;;  %vm169_vm12 = vcmp.eq.s32.totalorder %v770_v52, %v121_v17 }
  0xbf   :  { %501 = vmatmul.msk.f32.gmra.mxu1 %vm160_vm11, %v602_v56  ;;  %510 = vmatmul.msk.f32.gmra.mxu2 %vm169_vm12, %v602_v56 }
  0xc0   :  { %518 = vmatmul.msk.f32.gmra.mxu3 %vm177_vm13, %v602_v56 }
  0xc5   :  { %v73_v18 = vpop.permute.xlu0 %72  ;;  %v97_v19 = vpop.permute.xlu1 %96 }
  0xc6   :  { %vm153_vm14 = vcmp.eq.s32.totalorder %v770_v52, %v73_v18  ;;  %vm161_vm15 = vcmp.eq.s32.totalorder %v770_v52, %v97_v19 }
  0xc7   :  { %494 = vmatmul.msk.f32.gmra.mxu0 %vm153_vm14, %v602_v56  ;;  %502 = vmatmul.msk.f32.gmra.mxu1 %vm161_vm15, %v602_v56 }
  0xf4   :  { %v275_v21 = vpop.f32.mrf.mxu0 }
  0xf5   :  { %v373_v22 = vmul.f32 %v839_v20, %v275_v21 }
  0xf7   :  { %405 = vst [vmem:[#allocation3] sm:$0xff] %v373_v22 }
  0xfa   :  { %v323_v23 = vpop.f32.mrf.mxu2 }
  0xfb   :  { %v389_v24 = vmul.f32 %v839_v20, %v323_v23 }
  0xfc   :  { %v299_v25 = vpop.f32.mrf.mxu1 }
  0xfd   :  { %421 = vst [vmem:[#allocation3 + $0x80] sm:$0xff] %v389_v24  ;;  %v381_v26 = vmul.f32 %v839_v20, %v299_v25 }
  0xff   :  { %413 = vst [vmem:[#allocation3 + $0x40] sm:$0xff] %v381_v26 }
 0x102   :  { %v326_v27 = vpop.f32.mrf.mxu2 }
 0x103   :  { %v390_v28 = vmul.f32 %v839_v20, %v326_v27  ;;  %v347_v29 = vpop.f32.mrf.mxu3 }
 0x104   :  { %v397_v30 = vmul.f32 %v839_v20, %v347_v29  ;;  %v278_v31 = vpop.f32.mrf.mxu0  ;;  %v302_v32 = vpop.f32.mrf.mxu1 }
 0x105   :  { %422 = vst [vmem:[#allocation3 + $0x88] sm:$0xff] %v390_v28  ;;  %v374_v33 = vmul.f32 %v839_v20, %v278_v31  ;;  %v382_v34 = vmul.f32 %v839_v20, %v302_v32 }
 0x106   :  { %429 = vst [vmem:[#allocation3 + $0xc0] sm:$0xff] %v397_v30 }
 0x107   :  { %406 = vst [vmem:[#allocation3 + $0x8] sm:$0xff] %v374_v33 }
 0x108   :  { %414 = vst [vmem:[#allocation3 + $0x48] sm:$0xff] %v382_v34 }
 0x10b   :  { %v329_v35 = vpop.f32.mrf.mxu2  ;;  %v350_v36 = vpop.f32.mrf.mxu3 }
 0x10c   :  { %v391_v37 = vmul.f32 %v839_v20, %v329_v35  ;;  %v398_v38 = vmul.f32 %v839_v20, %v350_v36  ;;  %v281_v39 = vpop.f32.mrf.mxu0  ;;  %v305_v40 = vpop.f32.mrf.mxu1 }
 0x10d   :  { %v375_v41 = vmul.f32 %v839_v20, %v281_v39  ;;  %v383_v42 = vmul.f32 %v839_v20, %v305_v40 }
 0x10e   :  { %423 = vst [vmem:[#allocation3 + $0x90] sm:$0xff] %v391_v37 }
 0x10f   :  { %430 = vst [vmem:[#allocation3 + $0xc8] sm:$0xff] %v398_v38 }
 0x110   :  { %407 = vst [vmem:[#allocation3 + $0x10] sm:$0xff] %v375_v41 }
 0x111   :  { %415 = vst [vmem:[#allocation3 + $0x50] sm:$0xff] %v383_v42 }
 0x113   :  { %v353_v43 = vpop.f32.mrf.mxu3 }
 0x114   :  { %v399_v44 = vmul.f32 %v839_v20, %v353_v43  ;;  %v284_v45 = vpop.f32.mrf.mxu0 }
 0x115   :  { %v376_v46 = vmul.f32 %v839_v20, %v284_v45 }
 0x116   :  { %431 = vst [vmem:[#allocation3 + $0xd0] sm:$0xff] %v399_v44 }
 0x117   :  { %408 = vst [vmem:[#allocation3 + $0x18] sm:$0xff] %v376_v46 }
 0x11a   :  { %v332_v47 = vpop.f32.mrf.mxu2 }
 0x11b   :  { %v392_v48 = vmul.f32 %v839_v20, %v332_v47  ;;  %v356_v49 = vpop.f32.mrf.mxu3 }
 0x11c   :  { %v400_v50 = vmul.f32 %v839_v20, %v356_v49  ;;  %v308_v51 = vpop.f32.mrf.mxu1 }
 0x11d   :  { %424 = vst [vmem:[#allocation3 + $0x98] sm:$0xff] %v392_v48  ;;  %v384_v52 = vmul.f32 %v839_v20, %v308_v51 }
 0x11e   :  { %432 = vst [vmem:[#allocation3 + $0xd8] sm:$0xff] %v400_v50 }
 0x11f   :  { %416 = vst [vmem:[#allocation3 + $0x58] sm:$0xff] %v384_v52 }
 0x122   :  { %v335_v53 = vpop.f32.mrf.mxu2 }
 0x123   :  { %v393_v54 = vmul.f32 %v839_v20, %v335_v53  ;;  %v359_v55 = vpop.f32.mrf.mxu3 }
 0x124   :  { %v401_v56 = vmul.f32 %v839_v20, %v359_v55  ;;  %v287_v57 = vpop.f32.mrf.mxu0  ;;  %v311_v58 = vpop.f32.mrf.mxu1 }
 0x125   :  { %425 = vst [vmem:[#allocation3 + $0xa0] sm:$0xff] %v393_v54  ;;  %v377_v59 = vmul.f32 %v839_v20, %v287_v57  ;;  %v385_v60 = vmul.f32 %v839_v20, %v311_v58 }
 0x126   :  { %433 = vst [vmem:[#allocation3 + $0xe0] sm:$0xff] %v401_v56 }
 0x127   :  { %409 = vst [vmem:[#allocation3 + $0x20] sm:$0xff] %v377_v59 }
 0x128   :  { %417 = vst [vmem:[#allocation3 + $0x60] sm:$0xff] %v385_v60 }
 0x12b   :  { %v338_v61 = vpop.f32.mrf.mxu2 }
 0x12c   :  { %v394_v62 = vmul.f32 %v839_v20, %v338_v61  ;;  %v290_v63 = vpop.f32.mrf.mxu0  ;;  %v314_v0 = vpop.f32.mrf.mxu1 }
 0x12d   :  { %v378_v1 = vmul.f32 %v839_v20, %v290_v63  ;;  %v386_v2 = vmul.f32 %v839_v20, %v314_v0 }
 0x12e   :  { %426 = vst [vmem:[#allocation3 + $0xa8] sm:$0xff] %v394_v62 }
 0x12f   :  { %410 = vst [vmem:[#allocation3 + $0x28] sm:$0xff] %v378_v1 }
 0x130   :  { %418 = vst [vmem:[#allocation3 + $0x68] sm:$0xff] %v386_v2 }
 0x133   :  { %v362_v3 = vpop.f32.mrf.mxu3 }
 0x134   :  { %v402_v4 = vmul.f32 %v839_v20, %v362_v3  ;;  %v293_v5 = vpop.f32.mrf.mxu0 }
 0x135   :  { %v379_v6 = vmul.f32 %v839_v20, %v293_v5 }
 0x136   :  { %434 = vst [vmem:[#allocation3 + $0xe8] sm:$0xff] %v402_v4 }
 0x137   :  { %411 = vst [vmem:[#allocation3 + $0x30] sm:$0xff] %v379_v6 }
 0x13a   :  { %v341_v7 = vpop.f32.mrf.mxu2 }
 0x13b   :  { %v395_v8 = vmul.f32 %v839_v20, %v341_v7  ;;  %v365_v9 = vpop.f32.mrf.mxu3 }
 0x13c   :  { %v403_v10 = vmul.f32 %v839_v20, %v365_v9  ;;  %v317_v11 = vpop.f32.mrf.mxu1 }
 0x13d   :  { %427 = vst [vmem:[#allocation3 + $0xb0] sm:$0xff] %v395_v8  ;;  %v387_v12 = vmul.f32 %v839_v20, %v317_v11 }
 0x13e   :  { %435 = vst [vmem:[#allocation3 + $0xf0] sm:$0xff] %v403_v10 }
 0x13f   :  { %419 = vst [vmem:[#allocation3 + $0x70] sm:$0xff] %v387_v12 }
 0x142   :  { %v344_v13 = vpop.f32.mrf.mxu2 }
 0x143   :  { %v396_v14 = vmul.f32 %v839_v20, %v344_v13  ;;  %v368_v15 = vpop.f32.mrf.mxu3 }
 0x144   :  { %v404_v16 = vmul.f32 %v839_v20, %v368_v15  ;;  %v296_v17 = vpop.f32.mrf.mxu0  ;;  %v320_v18 = vpop.f32.mrf.mxu1 }
 0x145   :  { %428 = vst [vmem:[#allocation3 + $0xb8] sm:$0xff] %v396_v14  ;;  %v380_v19 = vmul.f32 %v839_v20, %v296_v17  ;;  %v388_v21 = vmul.f32 %v839_v20, %v320_v18 }
 0x146   :  { %436 = vst [vmem:[#allocation3 + $0xf8] sm:$0xff] %v404_v16 }
 0x147   :  { %412 = vst [vmem:[#allocation3 + $0x38] sm:$0xff] %v380_v19 }
 0x148   :  { %420 = vst [vmem:[#allocation3 + $0x78] sm:$0xff] %v388_v21 }
 0x149   :  { %449 = dma.vmem_to_hbm [thread:$0]  %s442_s27, 4096, %s444_s30, [#allocation4], %s604_s4, %s604_s4, %s605_s5  }
 0x14a   :  { %599 = dma.done.wait [#allocation4], 4096  }
 0x14b   :  { %600 = vsyncadd [#allocation4], 4294963200 }
 0x14c   :  { %454 = vsyncpa [#allocation4], 1 }

// kernel: tpu_custom_call.1
= control target key start
LH: loop header
LB: loop body
LE: loop exit
PB: predicated region body
PF: predicated region fallthrough
CT: control target
= control target key end

     0   :  { %v601_v3 = vmov 0   ;;  %s876_s0 = inlined_call_operand.<no memory space> [shape: f32[1], index: 0, kind: input, shape index: {}]   ;;  %s877_s1 = inlined_call_operand.vmem [shape: s32[256,1], index: 1, kind: input, shape index: {}]   ;;  %s878_s2 = inlined_call_operand.vmem [shape: f32[128,128], index: 2, kind: input, shape index: {}]   ;;  %s879_s3 = inlined_call_operand.hbm [shape: f32[256,128], index: 3, kind: output, shape index: {}]  }
   0x1   :  { %v33_v0 = vld [vmem:[%s877_s1 + $0x88] sm:$0xff]  ;;  %v32_v1 = vld [vmem:[%s877_s1 + $0x80] sm:$0xff]  ;;  %574 = vset.pattern.permute.xlu2 %v601_v3  ;;  %573 = vset.pattern.permute.xlu1 %v601_v3 }
   0x2   :  { %v16_v2 = vld [vmem:[%s877_s1] sm:$0xff]  ;;  %572 = vset.pattern.permute.xlu0 %v601_v3  ;;  %102 = vperm.xlu2 %574, %v33_v0  }
   0x3   :  { %99 = vperm.xlu0 %572, %v32_v1   ;;  %51 = vperm.xlu1 %573, %v16_v2  }
   0x4   :  { %9 = vsyncpa [#allocation4], 0  ;;  %v41_v4 = vld [vmem:[%s877_s1 + $0xc8] sm:$0xff]  ;;  %v40_v5 = vld [vmem:[%s877_s1 + $0xc0] sm:$0xff]  ;;  %v48_v51 = vlaneseq  ;;  %v602_v56 = vmov 1.0   ;;  %s443_s30 = sshll.u32 %s879_s3, 4  ;;  %s444_s30 = int_to_ptr.hbm [resolvable:$true] %s443_s30 }
   0x5   :  { %v24_v6 = vld [vmem:[%s877_s1 + $0x40] sm:$0xff]  ;;  %v34_v7 = vld [vmem:[%s877_s1 + $0x90] sm:$0xff]  ;;  %v17_v8 = vld [vmem:[%s877_s1 + $0x8] sm:$0xff]  ;;  %s604_s4 = smov 128   ;;  %s605_s5 = smov 8  }
   0x6   :  { %v25_v9 = vld [vmem:[%s877_s1 + $0x48] sm:$0xff]  ;;  %v26_v10 = vld [vmem:[%s877_s1 + $0x50] sm:$0xff]  ;;  %v19_v13 = vld [vmem:[%s877_s1 + $0x18] sm:$0xff]  ;;  %v770_v52 = vand.u32 127, %v48_v51 }
   0x7   :  { %v42_v11 = vld [vmem:[%s877_s1 + $0xd0] sm:$0xff]  ;;  %v35_v14 = vld [vmem:[%s877_s1 + $0x98] sm:$0xff]  ;;  %v44_v16 = vld [vmem:[%s877_s1 + $0xe0] sm:$0xff] }
   0x8   :  { %v18_v12 = vld [vmem:[%s877_s1 + $0x10] sm:$0xff]  ;;  %v43_v15 = vld [vmem:[%s877_s1 + $0xd8] sm:$0xff]  ;;  %v36_v18 = vld [vmem:[%s877_s1 + $0xa0] sm:$0xff] }
   0x9   :  { %v27_v17 = vld [vmem:[%s877_s1 + $0x58] sm:$0xff]  ;;  %v37_v19 = vld [vmem:[%s877_s1 + $0xa8] sm:$0xff]  ;;  %v20_v20 = vld [vmem:[%s877_s1 + $0x20] sm:$0xff] }
   0xa   :  { %126 = vperm.xlu2 %574, %v41_v4   ;;  %v28_v21 = vld [vmem:[%s877_s1 + $0x60] sm:$0xff]  ;;  %v257_v22 = vld [vmem:[%s878_s2 + $0x78] sm:$0xff]  ;;  %v256_v23 = vld [vmem:[%s878_s2 + $0x70] sm:$0xff] }
   0xb   :  { %123 = vperm.xlu0 %572, %v40_v5   ;;  %75 = vperm.xlu1 %573, %v24_v6   ;;  %v255_v24 = vld [vmem:[%s878_s2 + $0x68] sm:$0xff]  ;;  %v254_v28 = vld [vmem:[%s878_s2 + $0x60] sm:$0xff]  ;;  %v253_v29 = vld [vmem:[%s878_s2 + $0x58] sm:$0xff] }
   0xc   :  { %258 = vmatpush.msra.mxu0 %v257_v22  ;;  %520 = vmatpush.msra.mxu2 %v257_v22  ;;  %v29_v25 = vld [vmem:[%s877_s1 + $0x68] sm:$0xff]  ;;  %v22_v30 = vld [vmem:[%s877_s1 + $0x30] sm:$0xff]  ;;  %v250_v35 = vld [vmem:[%s878_s2 + $0x40] sm:$0xff] }
   0xd   :  { %519 = vmatpush.msra.mxu1 %v257_v22  ;;  %521 = vmatpush.msra.mxu3 %v257_v22  ;;  %v45_v26 = vld [vmem:[%s877_s1 + $0xe8] sm:$0xff]  ;;  %v252_v31 = vld [vmem:[%s878_s2 + $0x50] sm:$0xff]  ;;  %v249_v36 = vld [vmem:[%s878_s2 + $0x38] sm:$0xff] }
   0xe   :  { %259 = vmatpush.msra.mxu0 %v256_v23  ;;  %523 = vmatpush.msra.mxu2 %v256_v23  ;;  %v21_v27 = vld [vmem:[%s877_s1 + $0x28] sm:$0xff]  ;;  %v38_v32 = vld [vmem:[%s877_s1 + $0xb0] sm:$0xff]  ;;  %v47_v37 = vld [vmem:[%s877_s1 + $0xf8] sm:$0xff] }
   0xf   :  { %522 = vmatpush.msra.mxu1 %v256_v23  ;;  %524 = vmatpush.msra.mxu3 %v256_v23  ;;  %v46_v33 = vld [vmem:[%s877_s1 + $0xf0] sm:$0xff]  ;;  %v251_v34 = vld [vmem:[%s878_s2 + $0x48] sm:$0xff]  ;;  %v39_v39 = vld [vmem:[%s877_s1 + $0xb8] sm:$0xff] }
  0x10   :  { %260 = vmatpush.msra.mxu0 %v255_v24  ;;  %526 = vmatpush.msra.mxu2 %v255_v24  ;;  %v30_v38 = vld [vmem:[%s877_s1 + $0x70] sm:$0xff]  ;;  %v247_v41 = vld [vmem:[%s878_s2 + $0x28] sm:$0xff]  ;;  %v246_v42 = vld [vmem:[%s878_s2 + $0x20] sm:$0xff] }
  0x11   :  { %525 = vmatpush.msra.mxu1 %v255_v24  ;;  %527 = vmatpush.msra.mxu3 %v255_v24  ;;  %v248_v40 = vld [vmem:[%s878_s2 + $0x30] sm:$0xff]  ;;  %v245_v43 = vld [vmem:[%s878_s2 + $0x18] sm:$0xff]  ;;  %v243_v47 = vld [vmem:[%s878_s2 + $0x8] sm:$0xff] }
  0x12   :  { %105 = vperm.xlu2 %574, %v34_v7   ;;  %261 = vmatpush.msra.mxu0 %v254_v28  ;;  %v23_v44 = vld [vmem:[%s877_s1 + $0x38] sm:$0xff]  ;;  %v244_v46 = vld [vmem:[%s878_s2 + $0x10] sm:$0xff]  ;;  %v242_v48 = vld [vmem:[%s878_s2] sm:$0xff] }
  0x13   :  { %54 = vperm.xlu0 %572, %v17_v8   ;;  %78 = vperm.xlu1 %573, %v25_v9   ;;  %v31_v45 = vld [vmem:[%s877_s1 + $0x78] sm:$0xff] }
  0x14   :  { %529 = vmatpush.msra.mxu2 %v254_v28  ;;  %528 = vmatpush.msra.mxu1 %v254_v28 }
  0x15   :  { %530 = vmatpush.msra.mxu3 %v254_v28  ;;  %262 = vmatpush.msra.mxu0 %v253_v29 }
  0x16   :  { %532 = vmatpush.msra.mxu2 %v253_v29  ;;  %531 = vmatpush.msra.mxu1 %v253_v29 }
  0x17   :  { %533 = vmatpush.msra.mxu3 %v253_v29  ;;  %263 = vmatpush.msra.mxu0 %v252_v31 }
  0x18   :  { %535 = vmatpush.msra.mxu2 %v252_v31  ;;  %534 = vmatpush.msra.mxu1 %v252_v31 }
  0x19   :  { %264 = vmatpush.msra.mxu0 %v251_v34  ;;  %536 = vmatpush.msra.mxu3 %v252_v31 }
  0x1a   :  { %81 = vperm.xlu2 %574, %v26_v10   ;;  %538 = vmatpush.msra.mxu2 %v251_v34 }
  0x1b   :  { %129 = vperm.xlu0 %572, %v42_v11   ;;  %57 = vperm.xlu1 %573, %v18_v12  }
  0x1c   :  { %265 = vmatpush.msra.mxu0 %v250_v35  ;;  %537 = vmatpush.msra.mxu1 %v251_v34 }
  0x1d   :  { %539 = vmatpush.msra.mxu3 %v251_v34  ;;  %541 = vmatpush.msra.mxu2 %v250_v35 }
  0x1e   :  { %266 = vmatpush.msra.mxu0 %v249_v36  ;;  %540 = vmatpush.msra.mxu1 %v250_v35 }
  0x1f   :  { %542 = vmatpush.msra.mxu3 %v250_v35  ;;  %544 = vmatpush.msra.mxu2 %v249_v36 }
  0x20   :  { %267 = vmatpush.msra.mxu0 %v248_v40  ;;  %543 = vmatpush.msra.mxu1 %v249_v36 }
  0x21   :  { %547 = vmatpush.msra.mxu2 %v248_v40  ;;  %545 = vmatpush.msra.mxu3 %v249_v36 }
  0x22   :  { %60 = vperm.xlu2 %574, %v19_v13   ;;  %268 = vmatpush.msra.mxu0 %v247_v41 }
  0x23   :  { %108 = vperm.xlu0 %572, %v35_v14   ;;  %132 = vperm.xlu1 %573, %v43_v15  }
  0x24   :  { %550 = vmatpush.msra.mxu2 %v247_v41  ;;  %546 = vmatpush.msra.mxu1 %v248_v40 }
  0x25   :  { %548 = vmatpush.msra.mxu3 %v248_v40  ;;  %269 = vmatpush.msra.mxu0 %v246_v42 }
  0x26   :  { %553 = vmatpush.msra.mxu2 %v246_v42  ;;  %549 = vmatpush.msra.mxu1 %v247_v41 }
  0x27   :  { %551 = vmatpush.msra.mxu3 %v247_v41  ;;  %270 = vmatpush.msra.mxu0 %v245_v43 }
  0x28   :  { %556 = vmatpush.msra.mxu2 %v245_v43  ;;  %552 = vmatpush.msra.mxu1 %v246_v42 }
  0x29   :  { %271 = vmatpush.msra.mxu0 %v244_v46  ;;  %554 = vmatpush.msra.mxu3 %v246_v42 }
  0x2a   :  { %135 = vperm.xlu2 %574, %v44_v16   ;;  %559 = vmatpush.msra.mxu2 %v244_v46 }
  0x2b   :  { %84 = vperm.xlu0 %572, %v27_v17   ;;  %111 = vperm.xlu1 %573, %v36_v18  }
  0x2c   :  { %272 = vmatpush.msra.mxu0 %v243_v47  ;;  %562 = vmatpush.msra.mxu2 %v243_v47 }
  0x2d   :  { %555 = vmatpush.msra.mxu1 %v245_v43  ;;  %557 = vmatpush.msra.mxu3 %v245_v43 }
  0x2e   :  { %273 = vmatpush.msra.mxu0 %v242_v48  ;;  %565 = vmatpush.msra.mxu2 %v242_v48 }
  0x2f   :  { %558 = vmatpush.msra.mxu1 %v244_v46  ;;  %560 = vmatpush.msra.mxu3 %v244_v46 }
  0x31   :  { %561 = vmatpush.msra.mxu1 %v243_v47  ;;  %563 = vmatpush.msra.mxu3 %v243_v47 }
  0x32   :  { %114 = vperm.xlu2 %574, %v37_v19  }
  0x33   :  { %63 = vperm.xlu0 %572, %v20_v20   ;;  %87 = vperm.xlu1 %573, %v28_v21   ;;  %v839_v20 = vstv %s876_s0  ;;  %s603_s0 = smov [#allocation3]  }
  0x34   :  { %564 = vmatpush.msra.mxu1 %v242_v48  ;;  %566 = vmatpush.msra.mxu3 %v242_v48  ;;  %s441_s27 = sshll.u32 %s603_s0, 4  ;;  %s442_s27 = int_to_ptr.vmem [resolvable:$true] %s441_s27 }
  0x3a   :  { %90 = vperm.xlu2 %574, %v29_v25  }
  0x3b   :  { %138 = vperm.xlu0 %572, %v45_v26   ;;  %66 = vperm.xlu1 %573, %v21_v27  }
  0x42   :  { %69 = vperm.xlu2 %574, %v22_v30  }
  0x43   :  { %117 = vperm.xlu0 %572, %v38_v32   ;;  %141 = vperm.xlu1 %573, %v46_v33  }
  0x4a   :  { %144 = vperm.xlu2 %574, %v47_v37  }
  0x4b   :  { %93 = vperm.xlu0 %572, %v30_v38   ;;  %120 = vperm.xlu1 %573, %v39_v39  }
  0x53   :  { %72 = vperm.xlu0 %572, %v23_v44   ;;  %96 = vperm.xlu1 %573, %v31_v45  }
  0x5c   :  { %v103_v49 = vpop.permute.xlu2 %102 }
  0x5d   :  { %vm163_vm2 = vcmp.eq.s32.totalorder %v770_v52, %v103_v49 }
  0x64   :  { %v127_v50 = vpop.permute.xlu2 %126 }
  0x65   :  { %vm171_vm7 = vcmp.eq.s32.totalorder %v770_v52, %v127_v50 }
  0x6c   :  { %v106_v55 = vpop.permute.xlu2 %105 }
  0x6d   :  { %vm164_vm8 = vcmp.eq.s32.totalorder %v770_v52, %v106_v55 }
  0x74   :  { %v82_v59 = vpop.permute.xlu2 %81 }
  0x75   :  { %v100_v53 = vpop.permute.xlu0 %99  ;;  %v52_v54 = vpop.permute.xlu1 %51  ;;  %vm156_vm9 = vcmp.eq.s32.totalorder %v770_v52, %v82_v59 }
  0x76   :  { %vm162_vm0 = vcmp.eq.s32.totalorder %v770_v52, %v100_v53  ;;  %vm146_vm1 = vcmp.eq.s32.totalorder %v770_v52, %v52_v54 }
  0x77   :  { %487 = vmatmul.msk.f32.vlgmr.msra.gmra.mxu0 %vm146_vm1, %v602_v56  ;;  %503 = vmatmul.msk.f32.vlgmr.msra.gmra.mxu2 %vm162_vm0, %v602_v56 }
  0x7c   :  { %v61_v62 = vpop.permute.xlu2 %60 }
  0x7d   :  { %v124_v57 = vpop.permute.xlu0 %123  ;;  %v76_v58 = vpop.permute.xlu1 %75  ;;  %vm149_vm12 = vcmp.eq.s32.totalorder %v770_v52, %v61_v62 }
  0x7e   :  { %vm170_vm3 = vcmp.eq.s32.totalorder %v770_v52, %v124_v57  ;;  %vm154_vm4 = vcmp.eq.s32.totalorder %v770_v52, %v76_v58 }
  0x7f   :  { %495 = vmatmul.msk.f32.vlgmr.msra.gmra.mxu1 %vm154_vm4, %v602_v56  ;;  %504 = vmatmul.msk.f32.gmra.mxu2 %vm163_vm2, %v602_v56 }
  0x80   :  { %511 = vmatmul.msk.f32.vlgmr.msra.gmra.mxu3 %vm170_vm3, %v602_v56 }
  0x84   :  { %v136_v1 = vpop.permute.xlu2 %135 }
  0x85   :  { %v55_v60 = vpop.permute.xlu0 %54  ;;  %v79_v61 = vpop.permute.xlu1 %78  ;;  %vm174_vm1 = vcmp.eq.s32.totalorder %v770_v52, %v136_v1 }
  0x86   :  { %vm147_vm5 = vcmp.eq.s32.totalorder %v770_v52, %v55_v60  ;;  %vm155_vm6 = vcmp.eq.s32.totalorder %v770_v52, %v79_v61 }
  0x87   :  { %488 = vmatmul.msk.f32.gmra.mxu0 %vm147_vm5, %v602_v56  ;;  %496 = vmatmul.msk.f32.gmra.mxu1 %vm155_vm6, %v602_v56 }
  0x88   :  { %505 = vmatmul.msk.f32.gmra.mxu2 %vm164_vm8, %v602_v56  ;;  %512 = vmatmul.msk.f32.gmra.mxu3 %vm171_vm7, %v602_v56 }
  0x8c   :  { %v115_v6 = vpop.permute.xlu2 %114 }
  0x8d   :  { %v130_v63 = vpop.permute.xlu0 %129  ;;  %v58_v0 = vpop.permute.xlu1 %57  ;;  %vm167_vm4 = vcmp.eq.s32.totalorder %v770_v52, %v115_v6 }
  0x8e   :  { %vm172_vm10 = vcmp.eq.s32.totalorder %v770_v52, %v130_v63  ;;  %vm148_vm11 = vcmp.eq.s32.totalorder %v770_v52, %v58_v0 }
  0x8f   :  { %489 = vmatmul.msk.f32.gmra.mxu0 %vm148_vm11, %v602_v56  ;;  %497 = vmatmul.msk.f32.gmra.mxu1 %vm156_vm9, %v602_v56 }
  0x90   :  { %513 = vmatmul.msk.f32.gmra.mxu3 %vm172_vm10, %v602_v56 }
  0x94   :  { %v91_v9 = vpop.permute.xlu2 %90 }
  0x95   :  { %v109_v2 = vpop.permute.xlu0 %108  ;;  %v133_v3 = vpop.permute.xlu1 %132  ;;  %vm159_vm5 = vcmp.eq.s32.totalorder %v770_v52, %v91_v9 }
  0x96   :  { %vm165_vm13 = vcmp.eq.s32.totalorder %v770_v52, %v109_v2  ;;  %vm173_vm14 = vcmp.eq.s32.totalorder %v770_v52, %v133_v3 }
  0x97   :  { %490 = vmatmul.msk.f32.gmra.mxu0 %vm149_vm12, %v602_v56  ;;  %506 = vmatmul.msk.f32.gmra.mxu2 %vm165_vm13, %v602_v56 }
  0x98   :  { %514 = vmatmul.msk.f32.gmra.mxu3 %vm173_vm14, %v602_v56 }
  0x9c   :  { %v70_v12 = vpop.permute.xlu2 %69 }
  0x9d   :  { %v85_v4 = vpop.permute.xlu0 %84  ;;  %v112_v5 = vpop.permute.xlu1 %111  ;;  %vm152_vm8 = vcmp.eq.s32.totalorder %v770_v52, %v70_v12 }
  0x9e   :  { %vm157_vm15 = vcmp.eq.s32.totalorder %v770_v52, %v85_v4  ;;  %vm166_vm0 = vcmp.eq.s32.totalorder %v770_v52, %v112_v5 }
  0x9f   :  { %498 = vmatmul.msk.f32.gmra.mxu1 %vm157_vm15, %v602_v56  ;;  %507 = vmatmul.msk.f32.gmra.mxu2 %vm166_vm0, %v602_v56 }
  0xa0   :  { %515 = vmatmul.msk.f32.gmra.mxu3 %vm174_vm1, %v602_v56 }
  0xa4   :  { %v145_v15 = vpop.permute.xlu2 %144 }
  0xa5   :  { %v64_v7 = vpop.permute.xlu0 %63  ;;  %v88_v8 = vpop.permute.xlu1 %87  ;;  %vm177_vm13 = vcmp.eq.s32.totalorder %v770_v52, %v145_v15 }
  0xa6   :  { %vm150_vm2 = vcmp.eq.s32.totalorder %v770_v52, %v64_v7  ;;  %vm158_vm3 = vcmp.eq.s32.totalorder %v770_v52, %v88_v8 }
  0xa7   :  { %491 = vmatmul.msk.f32.gmra.mxu0 %vm150_vm2, %v602_v56  ;;  %499 = vmatmul.msk.f32.gmra.mxu1 %vm158_vm3, %v602_v56 }
  0xa8   :  { %508 = vmatmul.msk.f32.gmra.mxu2 %vm167_vm4, %v602_v56 }
  0xad   :  { %v139_v10 = vpop.permute.xlu0 %138  ;;  %v67_v11 = vpop.permute.xlu1 %66 }
  0xae   :  { %vm175_vm6 = vcmp.eq.s32.totalorder %v770_v52, %v139_v10  ;;  %vm151_vm7 = vcmp.eq.s32.totalorder %v770_v52, %v67_v11 }
  0xaf   :  { %492 = vmatmul.msk.f32.gmra.mxu0 %vm151_vm7, %v602_v56  ;;  %500 = vmatmul.msk.f32.gmra.mxu1 %vm159_vm5, %v602_v56 }
  0xb0   :  { %516 = vmatmul.msk.f32.gmra.mxu3 %vm175_vm6, %v602_v56 }
  0xb5   :  { %v118_v13 = vpop.permute.xlu0 %117  ;;  %v142_v14 = vpop.permute.xlu1 %141 }
  0xb6   :  { %vm168_vm9 = vcmp.eq.s32.totalorder %v770_v52, %v118_v13  ;;  %vm176_vm10 = vcmp.eq.s32.totalorder %v770_v52, %v142_v14 }
  0xb7   :  { %493 = vmatmul.msk.f32.gmra.mxu0 %vm152_vm8, %v602_v56  ;;  %509 = vmatmul.msk.f32.gmra.mxu2 %vm168_vm9, %v602_v56 }
  0xb8   :  { %517 = vmatmul.msk.f32.gmra.mxu3 %vm176_vm10, %v602_v56 }
  0xbd   :  { %v94_v16 = vpop.permute.xlu0 %93  ;;  %v121_v17 = vpop.permute.xlu1 %120 }
  0xbe   :  { %vm160_vm11 = vcmp.eq.s32.totalorder %v770_v52, %v94_v16  ;;  %vm169_vm12 = vcmp.eq.s32.totalorder %v770_v52, %v121_v17 }
  0xbf   :  { %501 = vmatmul.msk.f32.gmra.mxu1 %vm160_vm11, %v602_v56  ;;  %510 = vmatmul.msk.f32.gmra.mxu2 %vm169_vm12, %v602_v56 }
  0xc0   :  { %518 = vmatmul.msk.f32.gmra.mxu3 %vm177_vm13, %v602_v56 }
  0xc5   :  { %v73_v18 = vpop.permute.xlu0 %72  ;;  %v97_v19 = vpop.permute.xlu1 %96 }
  0xc6   :  { %vm153_vm14 = vcmp.eq.s32.totalorder %v770_v52, %v73_v18  ;;  %vm161_vm15 = vcmp.eq.s32.totalorder %v770_v52, %v97_v19 }
  0xc7   :  { %494 = vmatmul.msk.f32.gmra.mxu0 %vm153_vm14, %v602_v56  ;;  %502 = vmatmul.msk.f32.gmra.mxu1 %vm161_vm15, %v602_v56 }
  0xf4   :  { %v275_v21 = vpop.f32.mrf.mxu0 }
  0xf5   :  { %v373_v22 = vmul.f32 %v839_v20, %v275_v21 }
  0xf7   :  { %405 = vst [vmem:[#allocation3] sm:$0xff] %v373_v22 }
  0xfa   :  { %v323_v23 = vpop.f32.mrf.mxu2 }
  0xfb   :  { %v389_v24 = vmul.f32 %v839_v20, %v323_v23 }
  0xfc   :  { %v299_v25 = vpop.f32.mrf.mxu1 }
  0xfd   :  { %421 = vst [vmem:[#allocation3 + $0x80] sm:$0xff] %v389_v24  ;;  %v381_v26 = vmul.f32 %v839_v20, %v299_v25 }
  0xff   :  { %413 = vst [vmem:[#allocation3 + $0x40] sm:$0xff] %v381_v26 }
 0x102   :  { %v326_v27 = vpop.f32.mrf.mxu2 }
 0x103   :  { %v390_v28 = vmul.f32 %v839_v20, %v326_v27  ;;  %v347_v29 = vpop.f32.mrf.mxu3 }
 0x104   :  { %v397_v30 = vmul.f32 %v839_v20, %v347_v29  ;;  %v278_v31 = vpop.f32.mrf.mxu0  ;;  %v302_v32 = vpop.f32.mrf.mxu1 }
 0x105   :  { %422 = vst [vmem:[#allocation3 + $0x88] sm:$0xff] %v390_v28  ;;  %v374_v33 = vmul.f32 %v839_v20, %v278_v31  ;;  %v382_v34 = vmul.f32 %v839_v20, %v302_v32 }
 0x106   :  { %429 = vst [vmem:[#allocation3 + $0xc0] sm:$0xff] %v397_v30 }
 0x107   :  { %406 = vst [vmem:[#allocation3 + $0x8] sm:$0xff] %v374_v33 }
 0x108   :  { %414 = vst [vmem:[#allocation3 + $0x48] sm:$0xff] %v382_v34 }
 0x10b   :  { %v329_v35 = vpop.f32.mrf.mxu2  ;;  %v350_v36 = vpop.f32.mrf.mxu3 }
 0x10c   :  { %v391_v37 = vmul.f32 %v839_v20, %v329_v35  ;;  %v398_v38 = vmul.f32 %v839_v20, %v350_v36  ;;  %v281_v39 = vpop.f32.mrf.mxu0  ;;  %v305_v40 = vpop.f32.mrf.mxu1 }
 0x10d   :  { %v375_v41 = vmul.f32 %v839_v20, %v281_v39  ;;  %v383_v42 = vmul.f32 %v839_v20, %v305_v40 }
 0x10e   :  { %423 = vst [vmem:[#allocation3 + $0x90] sm:$0xff] %v391_v37 }
 0x10f   :  { %430 = vst [vmem:[#allocation3 + $0xc8] sm:$0xff] %v398_v38 }
 0x110   :  { %407 = vst [vmem:[#allocation3 + $0x10] sm:$0xff] %v375_v41 }
 0x111   :  { %415 = vst [vmem:[#allocation3 + $0x50] sm:$0xff] %v383_v42 }
 0x113   :  { %v353_v43 = vpop.f32.mrf.mxu3 }
 0x114   :  { %v399_v44 = vmul.f32 %v839_v20, %v353_v43  ;;  %v284_v45 = vpop.f32.mrf.mxu0 }
 0x115   :  { %v376_v46 = vmul.f32 %v839_v20, %v284_v45 }
 0x116   :  { %431 = vst [vmem:[#allocation3 + $0xd0] sm:$0xff] %v399_v44 }
 0x117   :  { %408 = vst [vmem:[#allocation3 + $0x18] sm:$0xff] %v376_v46 }
 0x11a   :  { %v332_v47 = vpop.f32.mrf.mxu2 }
 0x11b   :  { %v392_v48 = vmul.f32 %v839_v20, %v332_v47  ;;  %v356_v49 = vpop.f32.mrf.mxu3 }
 0x11c   :  { %v400_v50 = vmul.f32 %v839_v20, %v356_v49  ;;  %v308_v51 = vpop.f32.mrf.mxu1 }
 0x11d   :  { %424 = vst [vmem:[#allocation3 + $0x98] sm:$0xff] %v392_v48  ;;  %v384_v52 = vmul.f32 %v839_v20, %v308_v51 }
 0x11e   :  { %432 = vst [vmem:[#allocation3 + $0xd8] sm:$0xff] %v400_v50 }
 0x11f   :  { %416 = vst [vmem:[#allocation3 + $0x58] sm:$0xff] %v384_v52 }
 0x122   :  { %v335_v53 = vpop.f32.mrf.mxu2 }
 0x123   :  { %v393_v54 = vmul.f32 %v839_v20, %v335_v53  ;;  %v359_v55 = vpop.f32.mrf.mxu3 }
 0x124   :  { %v401_v56 = vmul.f32 %v839_v20, %v359_v55  ;;  %v287_v57 = vpop.f32.mrf.mxu0  ;;  %v311_v58 = vpop.f32.mrf.mxu1 }
 0x125   :  { %425 = vst [vmem:[#allocation3 + $0xa0] sm:$0xff] %v393_v54  ;;  %v377_v59 = vmul.f32 %v839_v20, %v287_v57  ;;  %v385_v60 = vmul.f32 %v839_v20, %v311_v58 }
 0x126   :  { %433 = vst [vmem:[#allocation3 + $0xe0] sm:$0xff] %v401_v56 }
 0x127   :  { %409 = vst [vmem:[#allocation3 + $0x20] sm:$0xff] %v377_v59 }
 0x128   :  { %417 = vst [vmem:[#allocation3 + $0x60] sm:$0xff] %v385_v60 }
 0x12b   :  { %v338_v61 = vpop.f32.mrf.mxu2 }
 0x12c   :  { %v394_v62 = vmul.f32 %v839_v20, %v338_v61  ;;  %v290_v63 = vpop.f32.mrf.mxu0  ;;  %v314_v0 = vpop.f32.mrf.mxu1 }
 0x12d   :  { %v378_v1 = vmul.f32 %v839_v20, %v290_v63  ;;  %v386_v2 = vmul.f32 %v839_v20, %v314_v0 }
 0x12e   :  { %426 = vst [vmem:[#allocation3 + $0xa8] sm:$0xff] %v394_v62 }
 0x12f   :  { %410 = vst [vmem:[#allocation3 + $0x28] sm:$0xff] %v378_v1 }
 0x130   :  { %418 = vst [vmem:[#allocation3 + $0x68] sm:$0xff] %v386_v2 }
 0x133   :  { %v362_v3 = vpop.f32.mrf.mxu3 }
 0x134   :  { %v402_v4 = vmul.f32 %v839_v20, %v362_v3  ;;  %v293_v5 = vpop.f32.mrf.mxu0 }
 0x135   :  { %v379_v6 = vmul.f32 %v839_v20, %v293_v5 }
 0x136   :  { %434 = vst [vmem:[#allocation3 + $0xe8] sm:$0xff] %v402_v4 }
 0x137   :  { %411 = vst [vmem:[#allocation3 + $0x30] sm:$0xff] %v379_v6 }
 0x13a   :  { %v341_v7 = vpop.f32.mrf.mxu2 }
 0x13b   :  { %v395_v8 = vmul.f32 %v839_v20, %v341_v7  ;;  %v365_v9 = vpop.f32.mrf.mxu3 }
 0x13c   :  { %v403_v10 = vmul.f32 %v839_v20, %v365_v9  ;;  %v317_v11 = vpop.f32.mrf.mxu1 }
 0x13d   :  { %427 = vst [vmem:[#allocation3 + $0xb0] sm:$0xff] %v395_v8  ;;  %v387_v12 = vmul.f32 %v839_v20, %v317_v11 }
 0x13e   :  { %435 = vst [vmem:[#allocation3 + $0xf0] sm:$0xff] %v403_v10 }
 0x13f   :  { %419 = vst [vmem:[#allocation3 + $0x70] sm:$0xff] %v387_v12 }
 0x142   :  { %v344_v13 = vpop.f32.mrf.mxu2 }
 0x143   :  { %v396_v14 = vmul.f32 %v839_v20, %v344_v13  ;;  %v368_v15 = vpop.f32.mrf.mxu3 }
 0x144   :  { %v404_v16 = vmul.f32 %v839_v20, %v368_v15  ;;  %v296_v17 = vpop.f32.mrf.mxu0  ;;  %v320_v18 = vpop.f32.mrf.mxu1 }
 0x145   :  { %428 = vst [vmem:[#allocation3 + $0xb8] sm:$0xff] %v396_v14  ;;  %v380_v19 = vmul.f32 %v839_v20, %v296_v17  ;;  %v388_v21 = vmul.f32 %v839_v20, %v320_v18 }
 0x146   :  { %436 = vst [vmem:[#allocation3 + $0xf8] sm:$0xff] %v404_v16 }
 0x147   :  { %412 = vst [vmem:[#allocation3 + $0x38] sm:$0xff] %v380_v19 }
 0x148   :  { %420 = vst [vmem:[#allocation3 + $0x78] sm:$0xff] %v388_v21 }
 0x149   :  { %449 = dma.vmem_to_hbm [thread:$0]  %s442_s27, 4096, %s444_s30, [#allocation4], %s604_s4, %s604_s4, %s605_s5  }
 0x14a   :  { %599 = dma.done.wait [#allocation4], 4096  }
 0x14b   :  { %600 = vsyncadd [#allocation4], 4294963200 }
 0x14c   :  { %454 = vsyncpa [#allocation4], 1 }

</bundles_post_ra>
